<compile_context>
chip_gen: v7x
topology: tpu7x:2x2x1
jax: 0.10.0
libtpu: 0.0.40
codegen_flags: <defaults>
</compile_context>

<pallas_src>
import jax
import jax.numpy as jnp
from jax.experimental import pallas as pl
from jax.experimental.pallas import tpu as pltpu

EPS = 1e-12
LEAKY_SLOPE = 0.01  # nn.LeakyReLU default


def _round_up(n, m):
    return ((n + m - 1) // m) * m


def _ngd_vel_kernel(xT_ref, mt_ref, c_ref,
                    w1_ref, b1_ref, w2_ref, b2_ref, w3_ref, b3_ref,
                    out_ref):
    xT = xT_ref[...]                                   # (d, TB) f32
    d = xT.shape[0]

    # ---- velocity scalar: FCNN in transposed layout (hidden padded to 128) ----
    x_mm = xT.astype(w1_ref.dtype)
    h1 = jnp.dot(w1_ref[...], x_mm,
                 preferred_element_type=jnp.float32) + b1_ref[...]       # (Hp, TB)
    h1 = jnp.where(h1 >= 0, h1, LEAKY_SLOPE * h1)
    h2 = jnp.dot(w2_ref[...], h1.astype(w2_ref.dtype),
                 preferred_element_type=jnp.float32) + b2_ref[...]       # (Hp, TB)
    h2 = jnp.where(h2 >= 0, h2, LEAKY_SLOPE * h2)
    # output layer (out_dim=1): VPU multiply + sublane reduce, kept in f32
    log_v = jnp.sum(h2 * w3_ref[...], axis=0, keepdims=True) + b3_ref[...]  # (1, TB)
    vel = jnp.exp(log_v) + EPS

    # ---- taskmap / natural-gradient path (folded): xd_hat^T = c - Mt @ x^T ----
    # d is tiny (4): do it on the VPU with statically unrolled FMAs, not the MXU.
    mt = mt_ref[...]                                   # (d, d)
    acc = jnp.zeros_like(xT)
    for i in range(d):
        acc = acc + mt[:, i:i + 1] * xT[i:i + 1, :]
    xd_hatT = c_ref[...] - acc                         # (d, TB)

    out_ref[...] = (vel * xd_hatT).astype(out_ref.dtype)


def ngd_vel_net_forward(x, params, *, max_tile_b=1024, use_bf16=True):
    """Forward pass of NaturalGradientDescentVelNet (scale_vel=True,
    is_diffeomorphism=True) with a linear taskmap and quadratic potential."""
    flatten_output = (x.ndim == 1)
    if flatten_output:
        x = x.reshape(1, -1)
    x = x.astype(jnp.float32)

    A = params["A"].astype(jnp.float32)
    origin = params["origin"].astype(jnp.float32).reshape(1, -1)
    W1, b1 = params["W1"], params["b1"]
    W2, b2 = params["W2"], params["b2"]
    W3, b3 = params["W3"], params["b3"]

    B, d = x.shape
    H = W1.shape[0]
    Hp = _round_up(H, 128)

    # --- glue: fold taskmap + its (constant) Jacobian inverse algebraically.
    #     bt and taskmap(origin) cancel exactly, so bt never reaches the kernel.
    #     xd_hat^T = c - Mt @ x^T,  Mt = A^{-1} A,  c = Mt @ origin^T
    A_inv = jnp.linalg.inv(A)                       # torch.inverse(J_hat) equivalent
    Mt = (A_inv @ A).astype(jnp.float32)            # kept general (== I only here)
    c = (Mt @ origin.reshape(d, 1)).astype(jnp.float32)

    mm_dtype = jnp.bfloat16 if use_bf16 else jnp.float32
    W1p = jnp.zeros((Hp, d), jnp.float32).at[:H, :].set(W1).astype(mm_dtype)
    b1p = jnp.zeros((Hp, 1), jnp.float32).at[:H, 0].set(b1)
    W2p = jnp.zeros((Hp, Hp), jnp.float32).at[:H, :H].set(W2).astype(mm_dtype)
    b2p = jnp.zeros((Hp, 1), jnp.float32).at[:H, 0].set(b2)
    w3p = jnp.zeros((Hp, 1), jnp.float32).at[:H, 0].set(W3.reshape(-1))
    b3p = jnp.asarray(b3, jnp.float32).reshape(1, 1)

    # --- batch tiling (lane axis = batch, padded to a multiple of 128)
    tile_b = min(max_tile_b, _round_up(B, 128))
    B_pad = _round_up(B, tile_b)
    xT = jnp.zeros((d, B_pad), jnp.float32).at[:, :B].set(x.T)

    grid = (B_pad // tile_b,)
    const = lambda i: (0, 0)

    cost = pl.CostEstimate(
        flops=2 * B_pad * (Hp * d + Hp * Hp + Hp + d * d),
        transcendentals=B_pad,
        bytes_accessed=int(
            2 * B_pad * d * 4
            + W1p.size * W1p.dtype.itemsize
            + W2p.size * W2p.dtype.itemsize
            + 4 * (3 * Hp + d * d + d + 1)),
    )

    out_t = pl.pallas_call(
        _ngd_vel_kernel,
        out_shape=jax.ShapeDtypeStruct((d, B_pad), jnp.float32),
        grid=grid,
        in_specs=[
            pl.BlockSpec((d, tile_b), lambda i: (0, i)),   # x^T tile
            pl.BlockSpec((d, d), const),                   # Mt
            pl.BlockSpec((d, 1), const),                   # c
            pl.BlockSpec((Hp, d), const),                  # W1 (padded)
            pl.BlockSpec((Hp, 1), const),                  # b1
            pl.BlockSpec((Hp, Hp), const),                 # W2 (padded)
            pl.BlockSpec((Hp, 1), const),                  # b2
            pl.BlockSpec((Hp, 1), const),                  # w3 column (padded)
            pl.BlockSpec((1, 1), const),                   # b3
        ],
        out_specs=pl.BlockSpec((d, tile_b), lambda i: (0, i)),
        compiler_params=pltpu.CompilerParams(
            dimension_semantics=("parallel",)),
        cost_estimate=cost,
    )(xT, Mt, c, W1p, b1p, W2p, b2p, w3p, b3p)

    out = out_t[:, :B].T
    if flatten_output:
        out = out.reshape(-1)
    return out


def _reference_forward(x, params, mirror_bf16=True):
    """Pure-JAX reference mirroring the PyTorch module semantics.
    If mirror_bf16, the two hidden-layer matmuls use bf16 operands / f32
    accumulation to match the kernel's MXU precision."""
    if x.ndim == 1:
        x = x.reshape(1, -1)
        flatten = True
    else:
        flatten = False
    A, bt, origin = params["A"], params["bt"], params["origin"]
    y0 = origin @ A.T + bt
    y = x @ A.T + bt
    y_hat = y - y0
    yd_hat = -y_hat
    J_inv = jnp.linalg.inv(A)
    xd_hat = yd_hat @ J_inv.T

    def leaky(v):
        return jnp.where(v >= 0, v, LEAKY_SLOPE * v)

    def mm(a, w):
        if mirror_bf16:
            return jnp.dot(a.astype(jnp.bfloat16), w.T.astype(jnp.bfloat16),
                           preferred_element_type=jnp.float32)
        return a @ w.T

    h1 = leaky(mm(x, params["W1"]) + params["b1"])
    h2 = leaky(mm(h1, params["W2"]) + params["b2"])
    log_v = h2 @ params["W3"].T + params["b3"]     # kernel keeps this layer in f32
    vel = jnp.exp(log_v) + EPS
    xd = vel * xd_hat
    if flatten:
        xd = xd.reshape(-1)
    return xd


def make_params(key, n_dim=4, hidden=100):
    ks = jax.random.split(key, 9)
    scale = 0.1
    A = jnp.eye(n_dim, dtype=jnp.float32) + scale * jax.random.normal(ks[0], (n_dim, n_dim), jnp.float32)
    bt = scale * jax.random.normal(ks[1], (n_dim,), jnp.float32)
    origin = jnp.zeros((1, n_dim), jnp.float32)
    W1 = scale * jax.random.normal(ks[2], (hidden, n_dim), jnp.float32)
    b1 = scale * jax.random.normal(ks[3], (hidden,), jnp.float32)
    W2 = scale * jax.random.normal(ks[4], (hidden, hidden), jnp.float32)
    b2 = scale * jax.random.normal(ks[5], (hidden,), jnp.float32)
    W3 = scale * jax.random.normal(ks[6], (1, hidden), jnp.float32)
    b3 = scale * jax.random.normal(ks[7], (1,), jnp.float32)
    return {"A": A, "bt": bt, "origin": origin,
            "W1": W1, "b1": b1, "W2": W2, "b2": b2, "W3": W3, "b3": b3}


if __name__ == "__main__":
    key = jax.random.PRNGKey(0)
    kp, kx, kx2 = jax.random.split(key, 3)
    n_dim = 4
    batch = 8
    params = make_params(kp, n_dim=n_dim, hidden=100)
    x = jax.random.normal(kx, (batch, n_dim), jnp.float32)

    # 1) default (bf16 matmul operands, f32 accumulation), single tile
    out = jax.block_until_ready(ngd_vel_net_forward(x, params))
    ref_bf16 = _reference_forward(x, params, mirror_bf16=True)
    ref_f32 = _reference_forward(x, params, mirror_bf16=False)
    assert out.shape == (batch, n_dim)
    assert jnp.allclose(out, ref_bf16, atol=1e-3, rtol=1e-3), (out, ref_bf16)
    assert jnp.allclose(out, ref_f32, atol=1e-2, rtol=5e-2), (out, ref_f32)

    # 2) multi-tile grid with a ragged batch (exercises padding + batch grid)
    x2 = jax.random.normal(kx2, (300, n_dim), jnp.float32)
    out2 = jax.block_until_ready(
        ngd_vel_net_forward(x2, params, max_tile_b=128))
    ref2 = _reference_forward(x2, params, mirror_bf16=True)
    assert out2.shape == (300, n_dim)
    assert jnp.allclose(out2, ref2, atol=1e-3, rtol=1e-3)

    # 3) 1-D input path (flatten_output semantics of the module)
    out1d = jax.block_until_ready(ngd_vel_net_forward(x[0], params))
    ref1d = _reference_forward(x[0], params, mirror_bf16=True)
    assert out1d.shape == (n_dim,)
    assert jnp.allclose(out1d, ref1d, atol=1e-3, rtol=1e-3)

    print("KERNEL_OK")
</pallas_src>

<mosaic_0001>
module attributes {stable_mosaic.version = 11 : i64} {
  func.func @_ngd_vel_kernel(%arg0: i32, %arg1: memref<4x128xf32, #tpu.memory_space<vmem>>, %arg2: memref<4x4xf32, #tpu.memory_space<vmem>>, %arg3: memref<4x1xf32, #tpu.memory_space<vmem>>, %arg4: memref<128x4xbf16, #tpu.memory_space<vmem>>, %arg5: memref<128x1xf32, #tpu.memory_space<vmem>>, %arg6: memref<128x128xbf16, #tpu.memory_space<vmem>>, %arg7: memref<128x1xf32, #tpu.memory_space<vmem>>, %arg8: memref<128x1xf32, #tpu.memory_space<vmem>>, %arg9: memref<1x1xf32, #tpu.memory_space<vmem>>, %arg10: memref<4x128xf32, #tpu.memory_space<vmem>>) attributes {dimension_semantics = [#tpu.dimension_semantics<parallel>], iteration_bounds = array<i64: 1>, scalar_prefetch = 0 : i64, scratch_operands = 0 : i64, tpu.core_type = #tpu.core_type<tc>, window_params = [{transform_indices = @transform_0, window_bounds = array<i64: 4, 128>}, {pipeline_mode = #tpu.pipeline_mode<synchronous>, transform_indices = @transform_1, window_bounds = array<i64: 4, 4>}, {pipeline_mode = #tpu.pipeline_mode<synchronous>, transform_indices = @transform_2, window_bounds = array<i64: 4, 1>}, {pipeline_mode = #tpu.pipeline_mode<synchronous>, transform_indices = @transform_3, window_bounds = array<i64: 128, 4>}, {pipeline_mode = #tpu.pipeline_mode<synchronous>, transform_indices = @transform_4, window_bounds = array<i64: 128, 1>}, {pipeline_mode = #tpu.pipeline_mode<synchronous>, transform_indices = @transform_5, window_bounds = array<i64: 128, 128>}, {pipeline_mode = #tpu.pipeline_mode<synchronous>, transform_indices = @transform_6, window_bounds = array<i64: 128, 1>}, {pipeline_mode = #tpu.pipeline_mode<synchronous>, transform_indices = @transform_7, window_bounds = array<i64: 128, 1>}, {pipeline_mode = #tpu.pipeline_mode<synchronous>, transform_indices = @transform_8, window_bounds = array<i64: 1, 1>}, {transform_indices = @transform_9, window_bounds = array<i64: 4, 128>}]} {
    %c0 = arith.constant 0 : index
    %c0_0 = arith.constant 0 : index
    %0 = vector.load %arg1[%c0, %c0_0] : memref<4x128xf32, #tpu.memory_space<vmem>>, vector<4x128xf32>
    %1 = arith.truncf %0 : vector<4x128xf32> to vector<4x128xbf16>
    %c0_1 = arith.constant 0 : index
    %c0_2 = arith.constant 0 : index
    %2 = vector.load %arg4[%c0_1, %c0_2] : memref<128x4xbf16, #tpu.memory_space<vmem>>, vector<128x4xbf16>
    %cst = arith.constant dense<0.000000e+00> : vector<128x128xf32>
    %3 = tpu.matmul %2, %1, %cst {dimension_numbers = #tpu.dot_dimension_numbers<[1], [0], [0], [1], [0, 0, 1, 1], [], []>} : vector<128x4xbf16>, vector<4x128xbf16>, vector<128x128xf32> -> vector<128x128xf32>
    %c0_3 = arith.constant 0 : index
    %c0_4 = arith.constant 0 : index
    %4 = vector.load %arg5[%c0_3, %c0_4] : memref<128x1xf32, #tpu.memory_space<vmem>>, vector<128x1xf32>
    %5 = vector.broadcast %4 : vector<128x1xf32> to vector<128x128xf32>
    %6 = arith.addf %3, %5 : vector<128x128xf32>
    %cst_5 = arith.constant 0.000000e+00 : f32
    %7 = vector.broadcast %cst_5 : f32 to vector<128x128xf32>
    %8 = arith.cmpf oge, %6, %7 : vector<128x128xf32>
    %cst_6 = arith.constant 0.00999999977 : f32
    %9 = vector.broadcast %cst_6 : f32 to vector<128x128xf32>
    %10 = arith.mulf %9, %6 : vector<128x128xf32>
    %11 = arith.select %8, %6, %10 : vector<128x128xi1>, vector<128x128xf32>
    %c0_7 = arith.constant 0 : index
    %c0_8 = arith.constant 0 : index
    %12 = vector.load %arg6[%c0_7, %c0_8] : memref<128x128xbf16, #tpu.memory_space<vmem>>, vector<128x128xbf16>
    %13 = arith.truncf %11 : vector<128x128xf32> to vector<128x128xbf16>
    %cst_9 = arith.constant dense<0.000000e+00> : vector<128x128xf32>
    %14 = tpu.matmul %12, %13, %cst_9 {dimension_numbers = #tpu.dot_dimension_numbers<[1], [0], [0], [1], [0, 0, 1, 1], [], []>} : vector<128x128xbf16>, vector<128x128xbf16>, vector<128x128xf32> -> vector<128x128xf32>
    %c0_10 = arith.constant 0 : index
    %c0_11 = arith.constant 0 : index
    %15 = vector.load %arg7[%c0_10, %c0_11] : memref<128x1xf32, #tpu.memory_space<vmem>>, vector<128x1xf32>
    %16 = vector.broadcast %15 : vector<128x1xf32> to vector<128x128xf32>
    %17 = arith.addf %14, %16 : vector<128x128xf32>
    %cst_12 = arith.constant 0.000000e+00 : f32
    %18 = vector.broadcast %cst_12 : f32 to vector<128x128xf32>
    %19 = arith.cmpf oge, %17, %18 : vector<128x128xf32>
    %cst_13 = arith.constant 0.00999999977 : f32
    %20 = vector.broadcast %cst_13 : f32 to vector<128x128xf32>
    %21 = arith.mulf %20, %17 : vector<128x128xf32>
    %22 = arith.select %19, %17, %21 : vector<128x128xi1>, vector<128x128xf32>
    %c0_14 = arith.constant 0 : index
    %c0_15 = arith.constant 0 : index
    %23 = vector.load %arg8[%c0_14, %c0_15] : memref<128x1xf32, #tpu.memory_space<vmem>>, vector<128x1xf32>
    %24 = vector.broadcast %23 : vector<128x1xf32> to vector<128x128xf32>
    %25 = arith.mulf %22, %24 : vector<128x128xf32>
    %cst_16 = arith.constant dense<0.000000e+00> : vector<128xf32>
    %26 = vector.multi_reduction <add>, %25, %cst_16 [0] : vector<128x128xf32> to vector<128xf32>
    %27 = vector.shape_cast %26 : vector<128xf32> to vector<1x128xf32>
    %c0_17 = arith.constant 0 : index
    %c0_18 = arith.constant 0 : index
    %28 = vector.load %arg9[%c0_17, %c0_18] : memref<1x1xf32, #tpu.memory_space<vmem>>, vector<1x1xf32>
    %29 = vector.broadcast %28 : vector<1x1xf32> to vector<1x128xf32>
    %30 = arith.addf %27, %29 : vector<1x128xf32>
    %31 = math.exp %30 : vector<1x128xf32>
    %cst_19 = arith.constant 9.99999996E-13 : f32
    %32 = vector.broadcast %cst_19 : f32 to vector<1x128xf32>
    %33 = arith.addf %31, %32 : vector<1x128xf32>
    %c0_20 = arith.constant 0 : index
    %c0_21 = arith.constant 0 : index
    %34 = vector.load %arg2[%c0_20, %c0_21] : memref<4x4xf32, #tpu.memory_space<vmem>>, vector<4x4xf32>
    %cst_22 = arith.constant 0.000000e+00 : f32
    %35 = vector.broadcast %cst_22 : f32 to vector<4x128xf32>
    %36 = vector.extract_strided_slice %34 {offsets = [0, 0], sizes = [4, 1], strides = [1, 1]} : vector<4x4xf32> to vector<4x1xf32>
    %37 = vector.extract_strided_slice %0 {offsets = [0, 0], sizes = [1, 128], strides = [1, 1]} : vector<4x128xf32> to vector<1x128xf32>
    %38 = vector.broadcast %36 : vector<4x1xf32> to vector<4x128xf32>
    %39 = vector.broadcast %37 : vector<1x128xf32> to vector<4x128xf32>
    %40 = arith.mulf %38, %39 : vector<4x128xf32>
    %41 = arith.addf %35, %40 : vector<4x128xf32>
    %42 = vector.extract_strided_slice %34 {offsets = [0, 1], sizes = [4, 1], strides = [1, 1]} : vector<4x4xf32> to vector<4x1xf32>
    %43 = vector.extract_strided_slice %0 {offsets = [1, 0], sizes = [1, 128], strides = [1, 1]} : vector<4x128xf32> to vector<1x128xf32>
    %44 = vector.broadcast %42 : vector<4x1xf32> to vector<4x128xf32>
    %45 = vector.broadcast %43 : vector<1x128xf32> to vector<4x128xf32>
    %46 = arith.mulf %44, %45 : vector<4x128xf32>
    %47 = arith.addf %41, %46 : vector<4x128xf32>
    %48 = vector.extract_strided_slice %34 {offsets = [0, 2], sizes = [4, 1], strides = [1, 1]} : vector<4x4xf32> to vector<4x1xf32>
    %49 = vector.extract_strided_slice %0 {offsets = [2, 0], sizes = [1, 128], strides = [1, 1]} : vector<4x128xf32> to vector<1x128xf32>
    %50 = vector.broadcast %48 : vector<4x1xf32> to vector<4x128xf32>
    %51 = vector.broadcast %49 : vector<1x128xf32> to vector<4x128xf32>
    %52 = arith.mulf %50, %51 : vector<4x128xf32>
    %53 = arith.addf %47, %52 : vector<4x128xf32>
    %54 = vector.extract_strided_slice %34 {offsets = [0, 3], sizes = [4, 1], strides = [1, 1]} : vector<4x4xf32> to vector<4x1xf32>
    %55 = vector.extract_strided_slice %0 {offsets = [3, 0], sizes = [1, 128], strides = [1, 1]} : vector<4x128xf32> to vector<1x128xf32>
    %56 = vector.broadcast %54 : vector<4x1xf32> to vector<4x128xf32>
    %57 = vector.broadcast %55 : vector<1x128xf32> to vector<4x128xf32>
    %58 = arith.mulf %56, %57 : vector<4x128xf32>
    %59 = arith.addf %53, %58 : vector<4x128xf32>
    %c0_23 = arith.constant 0 : index
    %c0_24 = arith.constant 0 : index
    %60 = vector.load %arg3[%c0_23, %c0_24] : memref<4x1xf32, #tpu.memory_space<vmem>>, vector<4x1xf32>
    %61 = vector.broadcast %60 : vector<4x1xf32> to vector<4x128xf32>
    %62 = arith.subf %61, %59 : vector<4x128xf32>
    %63 = vector.broadcast %33 : vector<1x128xf32> to vector<4x128xf32>
    %64 = arith.mulf %63, %62 : vector<4x128xf32>
    %c0_25 = arith.constant 0 : index
    %c0_26 = arith.constant 0 : index
    %65 = vector.load %arg10[%c0_25, %c0_26] : memref<4x128xf32, #tpu.memory_space<vmem>>, vector<4x128xf32>
    tpu.vector_store %arg10[%c0_25, %c0_26], %64 {strides = array<i32>} : memref<4x128xf32, #tpu.memory_space<vmem>>, vector<4x128xf32>,
    return
  }
  func.func @transform_0(%arg0: i32) -> (i32, i32) {
    %c0_i32 = arith.constant 0 : i32
    %c0_i32_0 = arith.constant 0 : i32
    return %c0_i32, %arg0 : i32, i32
  }
  func.func @transform_1(%arg0: i32) -> (i32, i32) {
    %c0_i32 = arith.constant 0 : i32
    %c0_i32_0 = arith.constant 0 : i32
    %c0_i32_1 = arith.constant 0 : i32
    return %c0_i32, %c0_i32_0 : i32, i32
  }
  func.func @transform_2(%arg0: i32) -> (i32, i32) {
    %c0_i32 = arith.constant 0 : i32
    %c0_i32_0 = arith.constant 0 : i32
    %c0_i32_1 = arith.constant 0 : i32
    return %c0_i32, %c0_i32_0 : i32, i32
  }
  func.func @transform_3(%arg0: i32) -> (i32, i32) {
    %c0_i32 = arith.constant 0 : i32
    %c0_i32_0 = arith.constant 0 : i32
    %c0_i32_1 = arith.constant 0 : i32
    return %c0_i32, %c0_i32_0 : i32, i32
  }
  func.func @transform_4(%arg0: i32) -> (i32, i32) {
    %c0_i32 = arith.constant 0 : i32
    %c0_i32_0 = arith.constant 0 : i32
    %c0_i32_1 = arith.constant 0 : i32
    return %c0_i32, %c0_i32_0 : i32, i32
  }
  func.func @transform_5(%arg0: i32) -> (i32, i32) {
    %c0_i32 = arith.constant 0 : i32
    %c0_i32_0 = arith.constant 0 : i32
    %c0_i32_1 = arith.constant 0 : i32
    return %c0_i32, %c0_i32_0 : i32, i32
  }
  func.func @transform_6(%arg0: i32) -> (i32, i32) {
    %c0_i32 = arith.constant 0 : i32
    %c0_i32_0 = arith.constant 0 : i32
    %c0_i32_1 = arith.constant 0 : i32
    return %c0_i32, %c0_i32_0 : i32, i32
  }
  func.func @transform_7(%arg0: i32) -> (i32, i32) {
    %c0_i32 = arith.constant 0 : i32
    %c0_i32_0 = arith.constant 0 : i32
    %c0_i32_1 = arith.constant 0 : i32
    return %c0_i32, %c0_i32_0 : i32, i32
  }
  func.func @transform_8(%arg0: i32) -> (i32, i32) {
    %c0_i32 = arith.constant 0 : i32
    %c0_i32_0 = arith.constant 0 : i32
    %c0_i32_1 = arith.constant 0 : i32
    return %c0_i32, %c0_i32_0 : i32, i32
  }
  func.func @transform_9(%arg0: i32) -> (i32, i32) {
    %c0_i32 = arith.constant 0 : i32
    %c0_i32_0 = arith.constant 0 : i32
    return %c0_i32, %arg0 : i32, i32
  }
}

</mosaic_0001>

<bundles_post_ra>
// kernel: tpu_custom_call.1
= control target key start
LH: loop header
LB: loop body
LE: loop exit
PB: predicated region body
PF: predicated region fallthrough
CT: control target
= control target key end

     0   :  { %s1372_s0 = inlined_call_operand.vmem [shape: f32[4,128], index: 0, kind: input, shape index: {}]   ;;  %s1373_s1 = inlined_call_operand.vmem [shape: f32[4,4], index: 1, kind: input, shape index: {}]   ;;  %s1374_s2 = inlined_call_operand.vmem [shape: f32[4,1], index: 2, kind: input, shape index: {}]   ;;  %s1375_s3 = inlined_call_operand.vmem [shape: bf16[128,4], index: 3, kind: input, shape index: {}]   ;;  %s1376_s4 = inlined_call_operand.vmem [shape: f32[128,1], index: 4, kind: input, shape index: {}]   ;;  %s1377_s5 = inlined_call_operand.vmem [shape: bf16[128,128], index: 5, kind: input, shape index: {}]   ;;  %s1378_s6 = inlined_call_operand.vmem [shape: f32[128,1], index: 6, kind: input, shape index: {}]   ;;  %s1379_s7 = inlined_call_operand.vmem [shape: f32[128,1], index: 7, kind: input, shape index: {}]   ;;  %s1380_s8 = inlined_call_operand.<no memory space> [shape: f32[1,1], index: 8, kind: input, shape index: {}]   ;;  %s1381_s9 = inlined_call_operand.hbm [shape: f32[4,128], index: 9, kind: output, shape index: {}]  }
   0x1   :  { %v14_v0 = vstv %s1380_s8 }
   0x2   :  { %15 = vst [vmem:[#allocation2] sm:$0x1] %v14_v0 }
   0x3   :  { %v56_v1 = vld [vmem:[%s1376_s4 + $0x10] sm:$0xff]  ;;  %v54_v2 = vld [vmem:[%s1376_s4] sm:$0xff]  ;;  %vm215_vm0 = vcmask 1041408   ;;  %v1058_v4 = vmov 0   ;;  %v57_v6 = vld [vmem:[%s1376_s4 + $0x18] sm:$0xff]  ;;  %vm190_vm1 = vcmask 31744  }
   0x4   :  { %v1125_v3 = vld [vmem:[%s1372_s0] sm:$0xf]  ;;  %1011 = vset.pattern.permute.xlu1 %v1058_v4  ;;  %1010 = vset.pattern.permute.xlu0 %v1058_v4  ;;  %v55_v9 = vld [vmem:[%s1376_s4 + $0x8] sm:$0xff]  ;;  %v1018_v11 = vld [vmem:[%s1375_s3 + $0x10] sm:$0xff]  }
   0x5   :  { %v37_v5 = vpack.c.bf16 %v1125_v3, %v1125_v3  ;;  %82 = vperm.xlu1 %1011, %v56_v1   ;;  %72 = vperm.xlu0 %1010, %v54_v2   ;;  %v1016_v7 = vld [vmem:[%s1375_s3] sm:$0xff]   ;;  %v1017_v10 = vld [vmem:[%s1375_s3 + $0x8] sm:$0xff]   ;;  %v61_v14 = vld [vmem:[%s1376_s4 + $0x38] sm:$0xff] }
   0x6   :  { %940 = vmatprep.mubr.msk.bf16.mxu0 %vm190_vm1, %v1016_v7  ;;  %v59_v12 = vld [vmem:[%s1376_s4 + $0x28] sm:$0xff]  ;;  %v58_v13 = vld [vmem:[%s1376_s4 + $0x20] sm:$0xff]  ;;  %v60_v15 = vld [vmem:[%s1376_s4 + $0x30] sm:$0xff] }
   0x7   :  { %1004 = vmatprep.subr.msk.bf16.mxu0 %vm215_vm0, %v37_v5  ;;  %v217_v8 = vsel %vm215_vm0, %v37_v5, 0  ;;  %v1019_v16 = vld [vmem:[%s1375_s3 + $0x18] sm:$0xff]   ;;  %v1020_v17 = vld [vmem:[%s1375_s3 + $0x20] sm:$0xff]   ;;  %v63_v18 = vld [vmem:[%s1376_s4 + $0x48] sm:$0xff] }
   0x8   :  { %939 = vmatpush3.bf16.msra.mxu0 %v217_v8  ;;  %v62_v19 = vld [vmem:[%s1376_s4 + $0x40] sm:$0xff]  ;;  %v65_v20 = vld [vmem:[%s1376_s4 + $0x58] sm:$0xff]  ;;  %v64_v21 = vld [vmem:[%s1376_s4 + $0x50] sm:$0xff] }
   0x9   :  { %87 = vperm.xlu1 %1011, %v57_v6   ;;  %77 = vperm.xlu0 %1010, %v55_v9   ;;  %v1021_v22 = vld [vmem:[%s1375_s3 + $0x28] sm:$0xff]   ;;  %v1022_v23 = vld [vmem:[%s1375_s3 + $0x30] sm:$0xff]   ;;  %v66_v25 = vld [vmem:[%s1376_s4 + $0x60] sm:$0xff] }
   0xa   :  { %v67_v24 = vld [vmem:[%s1376_s4 + $0x68] sm:$0xff]  ;;  %v69_v26 = vld [vmem:[%s1376_s4 + $0x78] sm:$0xff]  ;;  %v68_v27 = vld [vmem:[%s1376_s4 + $0x70] sm:$0xff] }
   0xb   :  { %941 = vmatmul.mubr.msk.bf16.vlgmr.msra.gmra.mrb[0].mxu0 %vm190_vm1, %v1017_v10  ;;  %v1023_v28 = vld [vmem:[%s1375_s3 + $0x38] sm:$0xff]  }
   0xc   :  { %944 = vmatprep.mubr.msk.bf16.mxu0 %vm190_vm1, %v1018_v11 }
   0xd   :  { %97 = vperm.xlu1 %1011, %v59_v12   ;;  %92 = vperm.xlu0 %1010, %v58_v13  }
  0x11   :  { %107 = vperm.xlu1 %1011, %v61_v14   ;;  %102 = vperm.xlu0 %1010, %v60_v15  }
  0x13   :  { %945 = vmatmul.mubr.msk.bf16.gmra.mrb[4].mxu0 %vm190_vm1, %v1019_v16 }
  0x14   :  { %948 = vmatprep.mubr.msk.bf16.mxu0 %vm190_vm1, %v1020_v17 }
  0x15   :  { %117 = vperm.xlu1 %1011, %v63_v18   ;;  %112 = vperm.xlu0 %1010, %v62_v19  }
  0x19   :  { %127 = vperm.xlu1 %1011, %v65_v20   ;;  %122 = vperm.xlu0 %1010, %v64_v21  }
  0x1b   :  { %949 = vmatmul.mubr.msk.bf16.gmra.mrb[8].mxu0 %vm190_vm1, %v1021_v22 }
  0x1c   :  { %952 = vmatprep.mubr.msk.bf16.mxu0 %vm190_vm1, %v1022_v23 }
  0x1d   :  { %137 = vperm.xlu1 %1011, %v67_v24   ;;  %132 = vperm.xlu0 %1010, %v66_v25  }
  0x21   :  { %147 = vperm.xlu1 %1011, %v69_v26   ;;  %142 = vperm.xlu0 %1010, %v68_v27  }
  0x22   :  { %16 = vsyncpa [#allocation4], 0  ;;  %v389_v29 = vld [vmem:[%s1378_s6 + $0x8] sm:$0xff]  ;;  %v388_v30 = vld [vmem:[%s1378_s6] sm:$0xff]  ;;  %v1059_v63 = vmov 2   ;;  %v1060_v0 = vmov 1  }
  0x23   :  { %953 = vmatmul.mubr.msk.bf16.gmra.mrb[12].mxu0 %vm190_vm1, %v1023_v28  ;;  %v391_v31 = vld [vmem:[%s1378_s6 + $0x18] sm:$0xff]  ;;  %v390_v32 = vld [vmem:[%s1378_s6 + $0x10] sm:$0xff]  ;;  %v393_v33 = vld [vmem:[%s1378_s6 + $0x28] sm:$0xff]  ;;  %v1061_v2 = vmov 3  }
  0x24   :  { %v392_v34 = vld [vmem:[%s1378_s6 + $0x20] sm:$0xff]  ;;  %v678_v35 = vld [vmem:[%s1379_s7 + $0x8] sm:$0xff]  ;;  %v680_v37 = vld [vmem:[%s1379_s7 + $0x18] sm:$0xff] }
  0x25   :  { %411 = vperm.xlu1 %1011, %v389_v29   ;;  %406 = vperm.xlu0 %1010, %v388_v30   ;;  %v677_v36 = vld [vmem:[%s1379_s7] sm:$0xff]  ;;  %v679_v38 = vld [vmem:[%s1379_s7 + $0x10] sm:$0xff]  ;;  %v682_v41 = vld [vmem:[%s1379_s7 + $0x28] sm:$0xff] }
  0x26   :  { %v681_v39 = vld [vmem:[%s1379_s7 + $0x20] sm:$0xff]  ;;  %v394_v40 = vld [vmem:[%s1378_s6 + $0x30] sm:$0xff]  ;;  %v395_v42 = vld [vmem:[%s1378_s6 + $0x38] sm:$0xff] }
  0x27   :  { %v683_v43 = vld [vmem:[%s1379_s7 + $0x30] sm:$0xff]  ;;  %v396_v44 = vld [vmem:[%s1378_s6 + $0x40] sm:$0xff]  ;;  %v684_v45 = vld [vmem:[%s1379_s7 + $0x38] sm:$0xff] }
  0x28   :  { %v397_v46 = vld [vmem:[%s1378_s6 + $0x48] sm:$0xff]  ;;  %v685_v47 = vld [vmem:[%s1379_s7 + $0x40] sm:$0xff]  ;;  %v398_v48 = vld [vmem:[%s1378_s6 + $0x50] sm:$0xff] }
  0x29   :  { %421 = vperm.xlu1 %1011, %v391_v31   ;;  %416 = vperm.xlu0 %1010, %v390_v32   ;;  %v686_v49 = vld [vmem:[%s1379_s7 + $0x48] sm:$0xff]  ;;  %v399_v50 = vld [vmem:[%s1378_s6 + $0x58] sm:$0xff]  ;;  %v687_v51 = vld [vmem:[%s1379_s7 + $0x50] sm:$0xff] }
  0x2a   :  { %v400_v52 = vld [vmem:[%s1378_s6 + $0x60] sm:$0xff]  ;;  %v688_v53 = vld [vmem:[%s1379_s7 + $0x58] sm:$0xff]  ;;  %v401_v54 = vld [vmem:[%s1378_s6 + $0x68] sm:$0xff] }
  0x2b   :  { %v689_v55 = vld [vmem:[%s1379_s7 + $0x60] sm:$0xff]  ;;  %v402_v56 = vld [vmem:[%s1378_s6 + $0x70] sm:$0xff]  ;;  %v690_v57 = vld [vmem:[%s1379_s7 + $0x68] sm:$0xff] }
  0x2c   :  { %v403_v58 = vld [vmem:[%s1378_s6 + $0x78] sm:$0xff]  ;;  %v691_v60 = vld [vmem:[%s1379_s7 + $0x70] sm:$0xff]  ;;  %v824_v61 = vld [vmem:[%s1373_s1] sm:$0xf] }
  0x2d   :  { %431 = vperm.xlu1 %1011, %v393_v33   ;;  %426 = vperm.xlu0 %1010, %v392_v34   ;;  %v692_v59 = vld [vmem:[%s1379_s7 + $0x78] sm:$0xff]  ;;  %v810_v62 = vld [vmem:[#allocation2] sm:$0x1]  ;;  %v1025_v6 = vld [vmem:[%s1377_s5 + $0x10] sm:$0xff]  }
  0x2e   :  { %v866_v1 = vld [vmem:[%s1374_s2] sm:$0xf]  ;;  %976 = vmatprep.mubr.bf16.mxu1 %v1025_v6 }
  0x2f   :  { %v1024_v5 = vld [vmem:[%s1377_s5] sm:$0xff]  }
  0x30   :  { %972 = vmatprep.mubr.bf16.mxu0 %v1024_v5 }
  0x31   :  { %700 = vperm.xlu1 %1011, %v678_v35   ;;  %695 = vperm.xlu0 %1010, %v677_v36  }
  0x35   :  { %710 = vperm.xlu1 %1011, %v680_v37   ;;  %705 = vperm.xlu0 %1010, %v679_v38  }
  0x39   :  { %715 = vperm.xlu1 %1011, %v681_v39   ;;  %436 = vperm.xlu0 %1010, %v394_v40  }
  0x3d   :  { %720 = vperm.xlu1 %1011, %v682_v41   ;;  %441 = vperm.xlu0 %1010, %v395_v42  }
  0x41   :  { %725 = vperm.xlu1 %1011, %v683_v43   ;;  %446 = vperm.xlu0 %1010, %v396_v44  }
  0x45   :  { %730 = vperm.xlu1 %1011, %v684_v45   ;;  %451 = vperm.xlu0 %1010, %v397_v46  }
  0x49   :  { %735 = vperm.xlu1 %1011, %v685_v47   ;;  %456 = vperm.xlu0 %1010, %v398_v48  }
  0x4d   :  { %740 = vperm.xlu1 %1011, %v686_v49   ;;  %461 = vperm.xlu0 %1010, %v399_v50  }
  0x51   :  { %745 = vperm.xlu1 %1011, %v687_v51   ;;  %466 = vperm.xlu0 %1010, %v400_v52  }
  0x55   :  { %750 = vperm.xlu1 %1011, %v688_v53   ;;  %471 = vperm.xlu0 %1010, %v401_v54  }
  0x59   :  { %755 = vperm.xlu1 %1011, %v689_v55   ;;  %476 = vperm.xlu0 %1010, %v402_v56  }
  0x5d   :  { %760 = vperm.xlu1 %1011, %v690_v57   ;;  %481 = vperm.xlu0 %1010, %v403_v58  }
  0x61   :  { %770 = vperm.xlu1 %1011, %v692_v59   ;;  %765 = vperm.xlu0 %1010, %v691_v60  }
  0x65   :  { %827 = vperm.xlu1 %1011, %v824_v61   ;;  %813 = vperm.xlu0 %1010, %v810_v62  }
  0x69   :  { %1013 = vset.pattern.permute.xlu1 %v1059_v63  ;;  %1012 = vset.pattern.permute.xlu0 %v1060_v0 }
  0x6a   :  { %847 = vperm.xlu1 %1013, %v824_v61   ;;  %837 = vperm.xlu0 %1012, %v824_v61  }
  0x6e   :  { %1014 = vset.pattern.permute.xlu1 %v1061_v2  ;;  %1015 = vset.pattern.permute.xlu0 %v1058_v4 }
  0x6f   :  { %857 = vperm.xlu1 %1014, %v824_v61   ;;  %869 = vperm.xlu0 %1015, %v866_v1  }
  0x84   :  { %v73_v7 = vpop.permute.xlu0 %72  ;;  %v83_v8 = vpop.permute.xlu1 %82 }
  0x88   :  { %v78_v9 = vpop.permute.xlu0 %77  ;;  %v88_v10 = vpop.permute.xlu1 %87 }
  0x8c   :  { %v93_v11 = vpop.permute.xlu0 %92  ;;  %v98_v12 = vpop.permute.xlu1 %97 }
  0x90   :  { %v103_v13 = vpop.permute.xlu0 %102  ;;  %v108_v16 = vpop.permute.xlu1 %107 }
  0x94   :  { %v113_v25 = vpop.permute.xlu0 %112  ;;  %v118_v29 = vpop.permute.xlu1 %117 }
  0x98   :  { %v123_v42 = vpop.permute.xlu0 %122  ;;  %v128_v46 = vpop.permute.xlu1 %127 }
  0x9c   :  { %v133_v57 = vpop.permute.xlu0 %132  ;;  %v138_v63 = vpop.permute.xlu1 %137 }
  0xde   :  { %v942_v4 = vpop.f32.mrb[0].mxu0 }
  0xdf   :  { %v262_v14 = vadd.f32 %v942_v4, %v83_v8  ;;  %v253_v15 = vpop.f32.mrb[1].mxu0  ;;  %v143_v8 = vpop.permute.xlu0 %142 }
  0xe0   :  { %v254_v17 = vadd.f32 %v253_v15, %v73_v7  ;;  %v943_v18 = vpop.f32.mrb[2].mxu0  ;;  %v148_v15 = vpop.permute.xlu1 %147 }
  0xe1   :  { %v334_v19 = vmul.f32 0.01, %v262_v14  ;;  %v265_v20 = vadd.f32 %v943_v18, %v88_v10  ;;  %vm318_vm2 = vcmp.ge.f32.partialorder %v262_v14, 0.0  ;;  %v256_v21 = vpop.f32.mrb[3].mxu0 }
  0xe2   :  { %v332_v22 = vmul.f32 0.01, %v254_v17  ;;  %v257_v24 = vadd.f32 %v256_v21, %v78_v9  ;;  %vm316_vm4 = vcmp.ge.f32.partialorder %v254_v17, 0.0 }
  0xe3   :  { %vm319_vm3 = vcmp.ge.f32.partialorder %v265_v20, 0.0  ;;  %v335_v23 = vmul.f32 0.01, %v265_v20  ;;  %v350_v26 = vsel %vm318_vm2, %v262_v14, %v334_v19 }
  0xe4   :  { %vm317_vm5 = vcmp.ge.f32.partialorder %v257_v24, 0.0  ;;  %v333_v28 = vmul.f32 0.01, %v257_v24  ;;  %v348_v32 = vsel %vm316_vm4, %v254_v17, %v332_v22 }
  0xe5   :  { %v351_v27 = vsel %vm319_vm3, %v265_v20, %v335_v23 }
  0xe6   :  { %v381_v30 = vpack.c.bf16 %v351_v27, %v350_v26  ;;  %v946_v31 = vpop.f32.mrb[4].mxu0  ;;  %v349_v33 = vsel %vm317_vm5, %v257_v24, %v333_v28 }
  0xe7   :  { %v278_v34 = vadd.f32 %v946_v31, %v103_v13  ;;  %v269_v35 = vpop.f32.mrb[5].mxu0  ;;  %v380_v36 = vpack.c.bf16 %v349_v33, %v348_v32  ;;  %v1026_v31 = vld [vmem:[%s1377_s5 + $0x8] sm:$0xff]   ;;  %v1027_v32 = vld [vmem:[%s1377_s5 + $0x18] sm:$0xff]   ;;  %v1028_v33 = vld [vmem:[%s1377_s5 + $0x20] sm:$0xff]  }
  0xe8   :  { %v270_v37 = vadd.f32 %v269_v35, %v93_v11  ;;  %v947_v38 = vpop.f32.mrb[6].mxu0  ;;  %v1030_v35 = vld [vmem:[%s1377_s5 + $0x30] sm:$0xff]  }
  0xe9   :  { %v338_v39 = vmul.f32 0.01, %v278_v34  ;;  %v281_v40 = vadd.f32 %v947_v38, %v108_v16  ;;  %v272_v41 = vpop.f32.mrb[7].mxu0  ;;  %vm322_vm6 = vcmp.ge.f32.partialorder %v278_v34, 0.0  ;;  %956 = vmatprep.subr.bf16.mxu0 %v380_v36  ;;  %988 = vmatprep.subr.bf16.mxu1 %v380_v36  ;;  %v412_v38 = vpop.permute.xlu1 %411 }
  0xea   :  { %v336_v43 = vmul.f32 0.01, %v270_v37  ;;  %v273_v44 = vadd.f32 %v272_v41, %v98_v12  ;;  %vm320_vm7 = vcmp.ge.f32.partialorder %v270_v37, 0.0  ;;  %957 = vmatpush3.bf16.msra.mxu0 %v380_v36  ;;  %996 = vmatpush3.bf16.msra.mxu1 %v380_v36  ;;  %v1031_v36 = vld [vmem:[%s1377_s5 + $0x38] sm:$0xff]  }
  0xeb   :  { %vm323_vm8 = vcmp.ge.f32.partialorder %v281_v40, 0.0  ;;  %v339_v45 = vmul.f32 0.01, %v281_v40  ;;  %958 = vmatprep.subr.bf16.mxu0 %v381_v30  ;;  %989 = vmatprep.subr.bf16.mxu1 %v381_v30  ;;  %v354_v48 = vsel %vm322_vm6, %v278_v34, %v338_v39  ;;  %v1029_v34 = vld [vmem:[%s1377_s5 + $0x28] sm:$0xff]   ;;  %s1062_s5 = smov [#allocation3]  }
  0xec   :  { %vm321_vm9 = vcmp.ge.f32.partialorder %v273_v44, 0.0  ;;  %v337_v47 = vmul.f32 0.01, %v273_v44  ;;  %v352_v50 = vsel %vm320_vm7, %v270_v37, %v336_v43  ;;  %v407_v37 = vpop.permute.xlu0 %406  ;;  %s881_s18 = sshll.u32 %s1062_s5, 4  ;;  %s882_s18 = int_to_ptr.vmem [resolvable:$true] %s881_s18 }
  0xed   :  { %v355_v49 = vsel %vm323_vm8, %v281_v40, %v339_v45  ;;  %v422_v40 = vpop.permute.xlu1 %421  ;;  %s1034_s3 = scalar_lea.vmem %s882_s18, 64  ;;  %p1039_p1 = scmp.lt.s32.totalorder %s882_s18, %s882_s18 }
  0xee   :  { %v383_v51 = vpack.c.bf16 %v355_v49, %v354_v48  ;;  %v353_v52 = vsel %vm321_vm9, %v273_v44, %v337_v47  ;;  %v950_v53 = vpop.f32.mrb[8].mxu0  ;;  %959 = vmatpush3.bf16.msra.mxu0 %v381_v30  ;;  %997 = vmatpush3.bf16.msra.mxu1 %v381_v30  ;;  %p1035_p0 = scmp.ne.s32.totalorder %s882_s18, %s1034_s3  ;;  %p1040_p2 = scmp.lt.s32.totalorder %s1034_s3, %s1034_s3 }
  0xef   :  { %v382_v54 = vpack.c.bf16 %v353_v52, %v352_v50  ;;  %v294_v55 = vadd.f32 %v950_v53, %v123_v42  ;;  %v285_v56 = vpop.f32.mrb[9].mxu0 }
  0xf0   :  { %v286_v58 = vadd.f32 %v285_v56, %v113_v25  ;;  %v951_v59 = vpop.f32.mrb[10].mxu0  ;;  %v417_v39 = vpop.permute.xlu0 %416  ;;  %p1041_p3 = por %p1040_p2, %p1039_p1 }
  0xf1   :  { %v342_v60 = vmul.f32 0.01, %v294_v55  ;;  %v297_v61 = vadd.f32 %v951_v59, %v128_v46  ;;  %v288_v62 = vpop.f32.mrb[11].mxu0  ;;  %960 = vmatprep.subr.bf16.mxu0 %v382_v54  ;;  %990 = vmatprep.subr.bf16.mxu1 %v382_v54  ;;  %vm326_vm10 = vcmp.ge.f32.partialorder %v294_v55, 0.0  ;;  %v432_v42 = vpop.permute.xlu1 %431 }
  0xf2   :  { %v340_v0 = vmul.f32 0.01, %v286_v58  ;;  %v289_v1 = vadd.f32 %v288_v62, %v118_v29  ;;  %vm324_vm11 = vcmp.ge.f32.partialorder %v286_v58, 0.0  ;;  %961 = vmatpush3.bf16.msra.mxu0 %v382_v54  ;;  %998 = vmatpush3.bf16.msra.mxu1 %v382_v54  ;;  %p1042_p4 = pnand %p1041_p3, %p1035_p0 }
  0xf3   :  { %vm327_vm12 = vcmp.ge.f32.partialorder %v297_v61, 0.0  ;;  %v343_v2 = vmul.f32 0.01, %v297_v61  ;;  %962 = vmatprep.subr.bf16.mxu0 %v383_v51  ;;  %991 = vmatprep.subr.bf16.mxu1 %v383_v51  ;;  %v358_v6 = vsel %vm326_vm10, %v294_v55, %v342_v60 }
  0xf4   :  { %vm325_vm13 = vcmp.ge.f32.partialorder %v289_v1, 0.0  ;;  %v341_v5 = vmul.f32 0.01, %v289_v1  ;;  %v356_v9 = vsel %vm324_vm11, %v286_v58, %v340_v0  ;;  %v427_v41 = vpop.permute.xlu0 %426 }
  0xf5   :  { %v359_v7 = vsel %vm327_vm12, %v297_v61, %v343_v2  ;;  %v701_v44 = vpop.permute.xlu1 %700 }
  0xf6   :  { %v385_v10 = vpack.c.bf16 %v359_v7, %v358_v6  ;;  %v357_v11 = vsel %vm325_vm13, %v289_v1, %v341_v5  ;;  %v954_v12 = vpop.f32.mrb[12].mxu0  ;;  %963 = vmatpush3.bf16.msra.mxu0 %v383_v51  ;;  %999 = vmatpush3.bf16.msra.mxu1 %v383_v51 }
  0xf7   :  { %v384_v13 = vpack.c.bf16 %v357_v11, %v356_v9  ;;  %v310_v4 = vadd.f32 %v954_v12, %v143_v8  ;;  %v301_v14 = vpop.f32.mrb[13].mxu0 }
  0xf8   :  { %v302_v16 = vadd.f32 %v301_v14, %v133_v57  ;;  %v955_v17 = vpop.f32.mrb[14].mxu0  ;;  %v696_v43 = vpop.permute.xlu0 %695 }
  0xf9   :  { %v346_v18 = vmul.f32 0.01, %v310_v4  ;;  %v313_v19 = vadd.f32 %v955_v17, %v148_v15  ;;  %v304_v20 = vpop.f32.mrb[15].mxu0  ;;  %964 = vmatprep.subr.bf16.mxu0 %v384_v13  ;;  %992 = vmatprep.subr.bf16.mxu1 %v384_v13  ;;  %vm330_vm14 = vcmp.ge.f32.partialorder %v310_v4, 0.0  ;;  %v711_v46 = vpop.permute.xlu1 %710 }
  0xfa   :  { %v344_v21 = vmul.f32 0.01, %v302_v16  ;;  %v305_v22 = vadd.f32 %v304_v20, %v138_v63  ;;  %vm328_vm15 = vcmp.ge.f32.partialorder %v302_v16, 0.0  ;;  %965 = vmatpush3.bf16.msra.mxu0 %v384_v13  ;;  %1000 = vmatpush3.bf16.msra.mxu1 %v384_v13 }
  0xfb   :  { %vm331_vm0 = vcmp.ge.f32.partialorder %v313_v19, 0.0  ;;  %v347_v23 = vmul.f32 0.01, %v313_v19  ;;  %966 = vmatprep.subr.bf16.mxu0 %v385_v10  ;;  %993 = vmatprep.subr.bf16.mxu1 %v385_v10  ;;  %v362_v25 = vsel %vm330_vm14, %v310_v4, %v346_v18 }
  0xfc   :  { %vm329_vm1 = vcmp.ge.f32.partialorder %v305_v22, 0.0  ;;  %v345_v24 = vmul.f32 0.01, %v305_v22  ;;  %v360_v27 = vsel %vm328_vm15, %v302_v16, %v344_v21  ;;  %v706_v45 = vpop.permute.xlu0 %705 }
  0xfd   :  { %v363_v26 = vsel %vm331_vm0, %v313_v19, %v347_v23  ;;  %v1332_v48 = vpop.permute.xlu1 %715 }
  0xfe   :  { %v387_v28 = vpack.c.bf16 %v363_v26, %v362_v25  ;;  %v361_v29 = vsel %vm329_vm1, %v305_v22, %v345_v24  ;;  %967 = vmatpush3.bf16.msra.mxu0 %v385_v10  ;;  %1001 = vmatpush3.bf16.msra.mxu1 %v385_v10 }
  0xff   :  { %v386_v30 = vpack.c.bf16 %v361_v29, %v360_v27 }
 0x100   :  { %v437_v47 = vpop.permute.xlu0 %436 }
 0x101   :  { %968 = vmatprep.subr.bf16.mxu0 %v386_v30  ;;  %994 = vmatprep.subr.bf16.mxu1 %v386_v30  ;;  %v1334_v50 = vpop.permute.xlu1 %720 }
 0x102   :  { %969 = vmatpush3.bf16.msra.mxu0 %v386_v30  ;;  %1002 = vmatpush3.bf16.msra.mxu1 %v386_v30 }
 0x103   :  { %970 = vmatprep.subr.bf16.mxu0 %v387_v28  ;;  %995 = vmatprep.subr.bf16.mxu1 %v387_v28 }
 0x104   :  { %v442_v49 = vpop.permute.xlu0 %441 }
 0x105   :  { %v1336_v52 = vpop.permute.xlu1 %725 }
 0x106   :  { %971 = vmatpush3.bf16.msra.mxu0 %v387_v28  ;;  %1003 = vmatpush3.bf16.msra.mxu1 %v387_v28 }
 0x108   :  { %v447_v51 = vpop.permute.xlu0 %446 }
 0x109   :  { %973 = vmatmul.mubr.bf16.vlgmr.msra.gmra.mrb[16].mxu0 %v1026_v31  ;;  %977 = vmatmul.mubr.bf16.vlgmr.msra.gmra.mrb[0].mxu1 %v1027_v32  ;;  %v1338_v54 = vpop.permute.xlu1 %730 }
 0x10a   :  { %980 = vmatprep.mubr.bf16.mxu1 %v1028_v33 }
 0x10c   :  { %v452_v53 = vpop.permute.xlu0 %451 }
 0x10d   :  { %v1342_v63 = vpop.permute.xlu1 %735 }
 0x110   :  { %v1340_v55 = vpop.permute.xlu0 %456 }
 0x111   :  { %981 = vmatmul.mubr.bf16.gmra.mrb[4].mxu1 %v1029_v34  ;;  %v1346_v4 = vpop.permute.xlu1 %740 }
 0x112   :  { %984 = vmatprep.mubr.bf16.mxu1 %v1030_v35 }
 0x114   :  { %v1344_v0 = vpop.permute.xlu0 %461 }
 0x115   :  { %v746_v31 = vpop.permute.xlu1 %745 }
 0x118   :  { %v467_v18 = vpop.permute.xlu0 %466 }
 0x119   :  { %985 = vmatmul.mubr.bf16.gmra.mrb[8].mxu1 %v1031_v36 }
 0x11c   :  { %v472_v36 = vpop.permute.xlu0 %471 }
 0x1dc   :  { %v974_v56 = vpop.f32.mrb[16].mxu0  ;;  %v978_v57 = vpop.f32.mrb[0].mxu1 }
 0x1dd   :  { %v566_v58 = vpop.f32.mrb[17].mxu0  ;;  %v582_v59 = vpop.f32.mrb[1].mxu1  ;;  %v575_v1 = vadd.f32 %v974_v56, %v417_v39  ;;  %v591_v21 = vadd.f32 %v978_v57, %v437_v47 }
 0x1de   :  { %v567_v60 = vadd.f32 %v566_v58, %v407_v37  ;;  %v975_v61 = vpop.f32.mrb[18].mxu0  ;;  %v979_v62 = vpop.f32.mrb[2].mxu1  ;;  %v583_v9 = vadd.f32 %v582_v59, %v427_v41 }
 0x1df   :  { %v569_v5 = vpop.f32.mrb[19].mxu0  ;;  %v585_v6 = vpop.f32.mrb[3].mxu1  ;;  %v578_v7 = vadd.f32 %v975_v61, %v422_v40  ;;  %v647_v8 = vmul.f32 0.01, %v575_v1  ;;  %vm631_vm3 = vcmp.ge.f32.partialorder %v575_v1, 0.0  ;;  %v594_v27 = vadd.f32 %v979_v62, %v442_v49 }
 0x1e0   :  { %v645_v2 = vmul.f32 0.01, %v567_v60  ;;  %vm629_vm2 = vcmp.ge.f32.partialorder %v567_v60, 0.0  ;;  %v570_v10 = vadd.f32 %v569_v5, %v412_v38  ;;  %v586_v16 = vadd.f32 %v585_v6, %v432_v42 }
 0x1e1   :  { %v648_v14 = vmul.f32 0.01, %v578_v7  ;;  %vm632_vm5 = vcmp.ge.f32.partialorder %v578_v7, 0.0  ;;  %v663_v20 = vsel %vm631_vm3, %v575_v1, %v647_v8  ;;  %v649_v22 = vmul.f32 0.01, %v583_v9 }
 0x1e2   :  { %v661_v12 = vsel %vm629_vm2, %v567_v60, %v645_v2  ;;  %vm630_vm4 = vcmp.ge.f32.partialorder %v570_v10, 0.0  ;;  %v646_v15 = vmul.f32 0.01, %v570_v10  ;;  %vm633_vm6 = vcmp.ge.f32.partialorder %v583_v9, 0.0 }
 0x1e3   :  { %v773_v24 = vmul.f32 %v696_v43, %v661_v12  ;;  %v664_v26 = vsel %vm632_vm5, %v578_v7, %v648_v14  ;;  %v650_v28 = vmul.f32 0.01, %v586_v16  ;;  %v775_v29 = vmul.f32 %v706_v45, %v663_v20 }
 0x1e4   :  { %v982_v11 = vpop.f32.mrb[4].mxu1  ;;  %v662_v23 = vsel %vm630_vm4, %v570_v10, %v646_v15  ;;  %vm634_vm7 = vcmp.ge.f32.partialorder %v586_v16, 0.0  ;;  %v651_v32 = vmul.f32 0.01, %v591_v21  ;;  %v665_v33 = vsel %vm633_vm6, %v583_v9, %v649_v22 }
 0x1e5   :  { %v598_v13 = vpop.f32.mrb[5].mxu1  ;;  %v774_v25 = vmul.f32 %v701_v44, %v662_v23  ;;  %vm635_vm8 = vcmp.ge.f32.partialorder %v591_v21, 0.0  ;;  %v776_v37 = vmul.f32 %v711_v46, %v664_v26  ;;  %v652_v40 = vmul.f32 0.01, %v594_v27  ;;  %v751_v46 = vpop.permute.xlu1 %750 }
 0x1e6   :  { %v983_v17 = vpop.f32.mrb[6].mxu1  ;;  %v599_v34 = vadd.f32 %v598_v13, %v447_v51  ;;  %v666_v41 = vsel %vm634_vm7, %v586_v16, %v650_v28  ;;  %v777_v44 = vmul.f32 %v1332_v48, %v665_v33  ;;  %vm636_vm9 = vcmp.ge.f32.partialorder %v594_v27, 0.0 }
 0x1e7   :  { %v601_v19 = vpop.f32.mrb[7].mxu1  ;;  %v789_v30 = vadd.f32 %v774_v25, %v773_v24  ;;  %v667_v49 = vsel %vm635_vm8, %v591_v21, %v651_v32  ;;  %v607_v56 = vadd.f32 %v982_v11, %v1340_v55  ;;  %v778_v51 = vmul.f32 %v1334_v50, %v666_v41 }
 0x1e8   :  { %v602_v42 = vadd.f32 %v601_v19, %v452_v53  ;;  %v653_v57 = vmul.f32 0.01, %v599_v34  ;;  %vm637_vm10 = vcmp.ge.f32.partialorder %v599_v34, 0.0  ;;  %v668_v59 = vsel %vm636_vm9, %v594_v27, %v652_v40  ;;  %v477_v53 = vpop.permute.xlu0 %476 }
 0x1e9   :  { %v790_v38 = vadd.f32 %v789_v30, %v775_v29  ;;  %v610_v60 = vadd.f32 %v983_v17, %v1344_v0  ;;  %v779_v62 = vmul.f32 %v1336_v52, %v667_v49  ;;  %v655_v1 = vmul.f32 0.01, %v607_v56  ;;  %v756_v0 = vpop.permute.xlu1 %755 }
 0x1ea   :  { %v654_v61 = vmul.f32 0.01, %v602_v42  ;;  %vm638_vm11 = vcmp.ge.f32.partialorder %v602_v42, 0.0  ;;  %v669_v2 = vsel %vm637_vm10, %v599_v34, %v653_v57  ;;  %v780_v55 = vmul.f32 %v1338_v54, %v668_v59 }
 0x1eb   :  { %v791_v45 = vadd.f32 %v790_v38, %v776_v37  ;;  %vm639_vm12 = vcmp.ge.f32.partialorder %v607_v56, 0.0  ;;  %v656_v50 = vmul.f32 0.01, %v610_v60  ;;  %v781_v9 = vmul.f32 %v1342_v63, %v669_v2 }
 0x1ec   :  { %v986_v35 = vpop.f32.mrb[8].mxu1  ;;  %v670_v7 = vsel %vm638_vm11, %v602_v42, %v654_v61  ;;  %vm640_vm13 = vcmp.ge.f32.partialorder %v610_v60, 0.0  ;;  %v671_v11 = vsel %vm639_vm12, %v607_v56, %v655_v1  ;;  %v482_v13 = vpop.permute.xlu0 %481  ;;  %v816_v37 = vlaneseq }
 0x1ed   :  { %v614_v39 = vpop.f32.mrb[9].mxu1  ;;  %v792_v58 = vadd.f32 %v791_v45, %v777_v44  ;;  %v623_v12 = vadd.f32 %v986_v35, %v477_v53  ;;  %v782_v15 = vmul.f32 %v1346_v4, %v670_v7  ;;  %v672_v16 = vsel %vm640_vm13, %v610_v60, %v656_v50  ;;  %v761_v23 = vpop.permute.xlu1 %760 }
 0x1ee   :  { %v987_v43 = vpop.f32.mrb[10].mxu1  ;;  %v615_v5 = vadd.f32 %v614_v39, %v467_v18  ;;  %v783_v18 = vmul.f32 %v746_v31, %v671_v11  ;;  %v784_v63 = vmul.f32 %v751_v46, %v672_v16  ;;  %v817_v40 = vshrl.u32 %v816_v37, 7 }
 0x1ef   :  { %v617_v47 = vpop.f32.mrb[11].mxu1  ;;  %v793_v48 = vadd.f32 %v792_v58, %v778_v51  ;;  %v626_v54 = vadd.f32 %v987_v43, %v482_v13  ;;  %v659_v20 = vmul.f32 0.01, %v623_v12  ;;  %vm643_vm0 = vcmp.ge.f32.partialorder %v623_v12, 0.0 }
 0x1f0   :  { %v618_v8 = vadd.f32 %v617_v47, %v472_v36  ;;  %v657_v52 = vmul.f32 0.01, %v615_v5  ;;  %vm641_vm14 = vcmp.ge.f32.partialorder %v615_v5, 0.0  ;;  %v766_v30 = vpop.permute.xlu0 %765  ;;  %v842_v43 = vsub.s32 1, %v817_v40 }
 0x1f1   :  { %v794_v6 = vadd.f32 %v793_v48, %v779_v62  ;;  %v660_v24 = vmul.f32 0.01, %v626_v54  ;;  %vm644_vm1 = vcmp.ge.f32.partialorder %v626_v54, 0.0  ;;  %v675_v28 = vsel %vm643_vm0, %v623_v12, %v659_v20  ;;  %v771_v34 = vpop.permute.xlu1 %770 }
 0x1f2   :  { %v658_v17 = vmul.f32 0.01, %v618_v8  ;;  %vm642_vm15 = vcmp.ge.f32.partialorder %v618_v8, 0.0  ;;  %v673_v21 = vsel %vm641_vm14, %v615_v5, %v657_v52  ;;  %v787_v33 = vmul.f32 %v766_v30, %v675_v28 }
 0x1f3   :  { %v795_v10 = vadd.f32 %v794_v6, %v780_v55  ;;  %v785_v26 = vmul.f32 %v756_v0, %v673_v21  ;;  %v676_v32 = vsel %vm644_vm1, %v626_v54, %v660_v24  ;;  %v818_v45 = vsub.s32 0, %v817_v40 }
 0x1f4   :  { %v674_v25 = vsel %vm642_vm15, %v618_v8, %v658_v17  ;;  %v788_v35 = vmul.f32 %v771_v34, %v676_v32  ;;  %v814_v41 = vpop.permute.xlu0 %813  ;;  %v843_v56 = vrot.slane %v1125_v3, %v842_v43  ;;  %v852_v57 = vsub.s32 2, %v817_v40 }
 0x1f5   :  { %v796_v14 = vadd.f32 %v795_v10, %v781_v9  ;;  %v786_v29 = vmul.f32 %v761_v23, %v674_v25  ;;  %v828_v47 = vpop.permute.xlu1 %827  ;;  %v833_v46 = vrot.slane %v1125_v3, %v818_v45  ;;  %v819_v59 = vrot.slane %v814_v41, %v818_v45 }
 0x1f6   :  { %v853_v62 = vrot.slane %v1125_v3, %v852_v57  ;;  %v862_v48 = vsub.s32 3, %v817_v40 }
 0x1f7   :  { %v797_v19 = vadd.f32 %v796_v14, %v782_v15  ;;  %v834_v2 = vmul.f32 %v833_v46, %v828_v47 }
 0x1f8   :  { %v838_v51 = vpop.permute.xlu0 %837  ;;  %v863_v50 = vrot.slane %v1125_v3, %v862_v48 }
 0x1f9   :  { %v798_v22 = vadd.f32 %v797_v19, %v783_v18  ;;  %v848_v60 = vpop.permute.xlu1 %847  ;;  %v844_v53 = vmul.f32 %v843_v56, %v838_v51 }
 0x1fa   :  { %v854_v6 = vmul.f32 %v853_v62, %v848_v60 }
 0x1fb   :  { %v799_v27 = vadd.f32 %v798_v22, %v784_v63  ;;  %v845_v55 = vadd.f32 %v844_v53, %v834_v2 }
 0x1fc   :  { %v870_v0 = vpop.permute.xlu0 %869 }
 0x1fd   :  { %v800_v4 = vadd.f32 %v799_v27, %v785_v26  ;;  %v858_v7 = vpop.permute.xlu1 %857  ;;  %v855_v8 = vadd.f32 %v854_v6, %v845_v55 }
 0x1fe   :  { %v864_v9 = vmul.f32 %v863_v50, %v858_v7 }
 0x1ff   :  { %v801_v31 = vadd.f32 %v800_v4, %v786_v29 }
 0x200   :  { %v865_v10 = vadd.f32 %v864_v9, %v855_v8 }
 0x201   :  { %v802_v36 = vadd.f32 %v801_v31, %v787_v33 }
 0x202   :  { %v872_v12 = vsub.f32 %v870_v0, %v865_v10 }
 0x203   :  { %v803_v38 = vadd.f32 %v802_v36, %v788_v35 }
 0x205   :  { %v804_v39 = vrot.slane %v803_v38, 4 }
 0x207   :  { %v805_v42 = vadd.f32 %v804_v39, %v803_v38 }
 0x209   :  { %v806_v44 = vrot.slane %v805_v42, 2 }
 0x20b   :  { %v807_v49 = vadd.f32 %v806_v44, %v805_v42 }
 0x20d   :  { %v808_v58 = vrot.slane %v807_v49, 1 }
 0x20f   :  { %v809_v61 = vadd.f32 %v808_v58, %v807_v49 }
 0x211   :  { %v820_v1 = vadd.f32 %v819_v59, %v809_v61 }
 0x213   :  { %v821_v5 = vmul.f32 1.442695, %v820_v1 }
 0x215   :  { %1032 = vpow2.f32 %v821_v5 }
 0x21f   :  { %v1033_v11 = vpop.eup %1032 }
 0x220   :  { %v823_v52 = vadd.f32 1e-12, %v1033_v11 }
 0x222   :  { %v873_v13 = vmul.f32 %v872_v12, %v823_v52 }
 0x224   :  { %874 = vst [vmem:[#allocation3] sm:$0xf] %v873_v13 }
 0x225   :  { %1045 = shalt.err (!%p1042_p4)
}
 0x226   :  { %s1046_s20 = scalar_lea.hbm %s1381_s9, 64 }
 0x227   :  { %p1047_p5 = scmp.ne.s32.totalorder %s1381_s9, %s1046_s20  ;;  %p1050_p6 = scmp.lt.u32.totalorder %s1046_s20, %s1381_s9 }
 0x229   :  { %p1052_p7 = pnand %p1050_p6, %p1047_p5 }
 0x22b   :  { %1055 = shalt.err (!%p1052_p7)
}
 0x22c   :  { %884 = dma.vmem_to_hbm [thread:$0]  %s882_s18, 64, %s1381_s9, [#allocation4]  }
 0x22d   :  { %1056 = dma.done.wait [#allocation4], 64  }
 0x22e   :  { %1057 = vsyncadd [#allocation4], 4294967232 }
 0x22f   :  { %888 = vsyncpa [#allocation4], 1 }

</bundles_post_ra>
